<compile_context>
chip_gen: v6e
topology: v6e:2x2x1
jax: 0.10.0
libtpu: 0.0.40
codegen_flags: <defaults>
</compile_context>

<pallas_src>
import jax
import jax.numpy as jnp
from jax import lax
from jax.experimental import pallas as pl
from jax.experimental.pallas import tpu as pltpu


def _choose_tile_hw(hw, c, itemsize, vmem_budget_bytes=20 * 1024 * 1024):
    """Largest lane-dense spatial tile (multiple of 128 dividing hw) whose
    pipelined footprint (2x input + 2x output blocks + compute headroom)
    fits the VMEM budget.  Falls back to the full spatial extent for small
    or awkwardly sized hw (then the block equals the full array dim, which
    is always legal)."""
    denom = max(1, 6 * c * itemsize)          # ~4 resident copies + headroom
    max_t = max(128, (vmem_budget_bytes // denom) // 128 * 128)
    if hw <= max_t:
        return hw
    t = max_t
    while t >= 128:
        if hw % t == 0:
            return t
        t -= 128
    return hw


def _sse_kernel(u_ref, w_ref, o_ref):
    # u_ref: (C, T) lane-dense spatial tile of one batch element
    # w_ref: (1, C) 1x1-conv weight (shared across all grid steps)
    # o_ref: (C, T) output tile
    u = u_ref[...]                       # keep input dtype (bf16 stays bf16)
    w = w_ref[...].astype(u.dtype)       # (1, C)

    # 1x1 conv over channels as a contraction; accumulate in f32 without
    # materializing a full-size f32 (C, T) product.
    q = lax.dot_general(
        w, u,
        dimension_numbers=(((1,), (0,)), ((), ())),
        preferred_element_type=jnp.float32)          # (1, T), f32
    q = jax.nn.sigmoid(q).astype(u.dtype)            # (1, T)

    # Spatial gate broadcast over channels; rescale in input dtype.
    o_ref[...] = (u * q).astype(o_ref.dtype)


def sse_forward(u, weight):
    """u: (N, C, H, W); weight: (1, C, 1, 1). Returns (N, C, H, W)."""
    N, C, H, W = u.shape
    HW = H * W

    # Free, contiguous reshapes: lane dim becomes H*W; weight becomes (1, C).
    u_flat = u.reshape(N, C, HW)
    w_flat = weight.reshape(1, C)

    tile_hw = _choose_tile_hw(HW, C, u.dtype.itemsize)
    grid = (N, pl.cdiv(HW, tile_hw))

    out = pl.pallas_call(
        _sse_kernel,
        out_shape=jax.ShapeDtypeStruct((N, C, HW), u.dtype),
        grid_spec=pltpu.PrefetchScalarGridSpec(
            num_scalar_prefetch=0,
            grid=grid,
            in_specs=[
                # Batch dim squeezed out of the kernel view -> (C, tile_hw).
                pl.BlockSpec((None, C, tile_hw), lambda n, s: (n, 0, s)),
                # Full (1, C) weight, resident every step.
                pl.BlockSpec((1, C), lambda n, s: (0, 0)),
            ],
            out_specs=pl.BlockSpec((None, C, tile_hw), lambda n, s: (n, 0, s)),
        ),
        compiler_params=pltpu.CompilerParams(
            dimension_semantics=("parallel", "parallel"),
            vmem_limit_bytes=48 * 1024 * 1024),
    )(u_flat, w_flat)

    return out.reshape(N, C, H, W)


def sse_reference(u, weight):
    q = jnp.sum(u.astype(jnp.float32) * weight.astype(jnp.float32),
                axis=1, keepdims=True)
    q = jax.nn.sigmoid(q).astype(u.dtype)
    return u * q


if __name__ == "__main__":
    key = jax.random.PRNGKey(0)
    k_u, k_w = jax.random.split(key)

    N, C, H, W = 2, 4, 16, 16
    u = jax.random.normal(k_u, (N, C, H, W), dtype=jnp.float32)
    # Deterministic Conv2d(C, 1, 1, bias=False) weight: shape (1, C, 1, 1).
    weight = jax.random.normal(k_w, (1, C, 1, 1), dtype=jnp.float32) * 0.5

    out = sse_forward(u, weight)
    out = jax.block_until_ready(out)

    ref = sse_reference(u, weight)
    assert out.shape == (N, C, H, W)
    assert jnp.allclose(out, ref, atol=1e-5, rtol=1e-5), "mismatch vs reference"

    print("KERNEL_OK")
</pallas_src>

<mosaic_0001>
module attributes {stable_mosaic.version = 11 : i64} {
  func.func @_sse_kernel(%arg0: i32, %arg1: i32, %arg2: memref<1x4x256xf32, #tpu.memory_space<vmem>>, %arg3: memref<1x4xf32, #tpu.memory_space<vmem>>, %arg4: memref<1x4x256xf32, #tpu.memory_space<vmem>>) attributes {dimension_semantics = [#tpu.dimension_semantics<parallel>, #tpu.dimension_semantics<parallel>], iteration_bounds = array<i64: 2, 1>, scalar_prefetch = 0 : i64, scratch_operands = 0 : i64, tpu.core_type = #tpu.core_type<tc>, window_params = [{transform_indices = @transform_0, window_bounds = array<i64: 1, 4, 256>}, {pipeline_mode = #tpu.pipeline_mode<synchronous>, transform_indices = @transform_1, window_bounds = array<i64: 1, 4>}, {transform_indices = @transform_2, window_bounds = array<i64: 1, 4, 256>}]} {
    %c0 = arith.constant 0 : index
    %c0_0 = arith.constant 0 : index
    %c0_1 = arith.constant 0 : index
    %0 = vector.load %arg2[%c0, %c0_0, %c0_1] : memref<1x4x256xf32, #tpu.memory_space<vmem>>, vector<1x4x256xf32>
    %1 = vector.shape_cast %0 : vector<1x4x256xf32> to vector<4x256xf32>
    %c0_2 = arith.constant 0 : index
    %c0_3 = arith.constant 0 : index
    %2 = vector.load %arg3[%c0_2, %c0_3] : memref<1x4xf32, #tpu.memory_space<vmem>>, vector<1x4xf32>
    %cst = arith.constant dense<0.000000e+00> : vector<1x256xf32>
    %3 = tpu.matmul %2, %1, %cst {dimension_numbers = #tpu.dot_dimension_numbers<[1], [0], [0], [1], [0, 0, 1, 1], [], []>} : vector<1x4xf32>, vector<4x256xf32>, vector<1x256xf32> -> vector<1x256xf32>
    %4 = arith.negf %3 : vector<1x256xf32>
    %5 = math.exp %4 : vector<1x256xf32>
    %cst_4 = arith.constant 1.000000e+00 : f32
    %6 = vector.broadcast %cst_4 : f32 to vector<1x256xf32>
    %7 = arith.addf %6, %5 : vector<1x256xf32>
    %8 = arith.divf %6, %7 : vector<1x256xf32>
    %9 = vector.broadcast %8 : vector<1x256xf32> to vector<4x256xf32>
    %10 = arith.mulf %1, %9 : vector<4x256xf32>
    %c0_5 = arith.constant 0 : index
    %c0_6 = arith.constant 0 : index
    %c0_7 = arith.constant 0 : index
    %11 = vector.load %arg4[%c0_5, %c0_6, %c0_7] : memref<1x4x256xf32, #tpu.memory_space<vmem>>, vector<1x4x256xf32>
    %12 = vector.shape_cast %11 : vector<1x4x256xf32> to vector<4x256xf32>
    %13 = vector.shape_cast %10 : vector<4x256xf32> to vector<1x4x256xf32>
    tpu.vector_store %arg4[%c0_5, %c0_6, %c0_7], %13 {strides = array<i32>} : memref<1x4x256xf32, #tpu.memory_space<vmem>>, vector<1x4x256xf32>,
    return
  }
  func.func @transform_0(%arg0: i32, %arg1: i32) -> (i32, i32, i32) {
    %c0_i32 = arith.constant 0 : i32
    %c0_i32_0 = arith.constant 0 : i32
    return %arg0, %c0_i32, %arg1 : i32, i32, i32
  }
  func.func @transform_1(%arg0: i32, %arg1: i32) -> (i32, i32) {
    %c0_i32 = arith.constant 0 : i32
    %c0_i32_0 = arith.constant 0 : i32
    %c0_i32_1 = arith.constant 0 : i32
    return %c0_i32, %c0_i32_0 : i32, i32
  }
  func.func @transform_2(%arg0: i32, %arg1: i32) -> (i32, i32, i32) {
    %c0_i32 = arith.constant 0 : i32
    %c0_i32_0 = arith.constant 0 : i32
    return %arg0, %c0_i32, %arg1 : i32, i32, i32
  }
}

</mosaic_0001>

<bundles_post_ra>
// kernel: tpu_custom_call.1
= control target key start
LH: loop header
LB: loop body
LE: loop exit
PB: predicated region body
PF: predicated region fallthrough
CT: control target
= control target key end

     0   :  { %7 = vsyncpa [#allocation3], 0  ;;  %s754_s0 = inlined_call_operand.hbm [shape: f32[2,4,256], index: 0, kind: input, shape index: {}]   ;;  %s755_s1 = inlined_call_operand.vmem [shape: f32[1,4], index: 1, kind: input, shape index: {}]   ;;  %s756_s2 = inlined_call_operand.hbm [shape: f32[2,4,256], index: 2, kind: output, shape index: {}]  }
   0x1   :  { %9 = vsyncpa [#allocation3 + $0x1], 0 }
   0x2   :  { %10 = vsyncpa [#allocation4], 0 }
   0x3   :  { %12 = vsyncpa [#allocation4 + $0x1], 0  ;;  %s613_s9 = smov 0   ;;  %s615_s10 = smov 0  }
   0x4   :  { %s617_s11 = smov 0   ;;  %s619_s12 = smov 0  }
   0x5   :  { %s621_s13 = smov 0   ;;  %s623_s14 = smov 0  }
   0x6 LB: > { %s391_s15 = sadd.s32 4294967295, %s593_s14   ;;  %s392_s16 = sadd.s32 4294967294, %s593_s14   ;;  %s593_s14 = sphi %s623_s14, %s18_s14   ;;  %s589_s13 = sphi %s621_s13, %s768_s13   ;;  %s585_s12 = sphi %s619_s12, %s767_s12   ;;  %s581_s11 = sphi %s617_s11, %s766_s11   ;;  %s577_s10 = sphi %s615_s10, %s765_s10   ;;  %s573_s9 = sphi %s613_s9, %s764_s9  }
   0x7   : > { %s30_s17 = sadd.s32 1, %s589_s13  ;;  %s39_s18 = sadd.s32 1, %s581_s11 }
   0x8   : > { %p32_p0 = scmp.ge.s32.totalorder %s30_s17, 2  ;;  %p46_p1 = scmp.ne.s32.totalorder %s581_s11, %s577_s10 }
   0x9   : > { %p47_p2 = scmp.eq.s32.totalorder %s593_s14, 0  ;;  %p52_p3 = scmp.ne.s32.totalorder %s577_s10, %s573_s9 }
   0xa   : > { %s770_s17 = smov (%p32_p0, %s30_s17), 0  ;;  %p53_p5 = scmp.eq.s32.totalorder %s391_s15, 0 }
   0xb   : > { %p654_p4 = por %p47_p2, %p46_p1  ;;  %s34_s20 = ssub.s32 %s589_s13, %s770_s17 }
   0xc   : > { %p99_p6 = scmp.eq.s32.totalorder %s391_s15, 1  ;;  %p37_p7 = scmp.eq.s32.totalorder %s34_s20, 0 }
   0xd   : > { %p660_p8 = por %p53_p5, %p52_p3  ;;  %p105_p10 = scmp.eq.s32.totalorder %s392_s16, 1 }
   0xe   : > { %p664_p9 = por %p99_p6, %p46_p1  ;;  %p425_p13 = scmp.lt.s32.totalorder %s593_s14, 2 }
   0xf   : > { %s669_s23 = scalar_select %p37_p7, %s581_s11, %s39_s18  }
  0x10   : > { %p671_p11 = por %p105_p10, %p52_p3  ;;  %s128_s25 = sand.u32 1, %s581_s11  }
  0x11   : > { %s395_s26 = sshll.u32 %s128_s25, 3  ;;  %s411_s27 = sshll.u32 %s589_s13, 7 }
  0x12   : > { %s760_s24 = scalar_select %p671_p11, 1, 0 }
  0x13   : > { %s140_s30 = scalar_lea.hbm %s754_s0, %s411_s27  ;;  %s132_s3 = scalar_lea.vmem [#allocation2], %s395_s26 }
  0x14   : > { %s142_s4 = sshll.u32 %s132_s3, 4  ;;  %p684_p0 = pnand %p425_p13, %p654_p4  ;;  %s143_s4 = int_to_ptr.vmem [resolvable:$true] %s142_s4 }
  0x15   : > { %p398_p1 = scmp.ge.s32.totalorder %s593_s14, 1  ;;  %p147_p2 = scmp.lt.s32.totalorder %s593_s14, 3 }
  0x16   : > { %s129_s6 = scalar_lea.sflag [#allocation3], %s128_s25  ;;  %p487_p3 = pneg %p684_p0 }
  0x17   : > { %s498_s7 = scalar_lea.vmem %s143_s4, 128  ;;  %s595_s8 = smov [#allocation2]  }
  0x18   : > { %p499_p5 = scmp.ne.s32.totalorder %s143_s4, %s498_s7  ;;  %s503_s15 = sshll.u32 %s595_s8, 4  ;;  %s504_s15 = int_to_ptr.vmem [resolvable:$false] %s503_s15 }
  0x19   : > { %s505_s16 = scalar_lea.vmem %s504_s15, 256  ;;  %p506_p10 = scmp.lt.s32.totalorder %s143_s4, %s504_s15 }
  0x1a   : > { %p501_p6 = pnand %p499_p5, %p487_p3  ;;  %p507_p12 = scmp.lt.s32.totalorder %s505_s16, %s498_s7 }
  0x1c   : > { %p502_p7 = pneg %p501_p6  ;;  %p508_p4 = por %p507_p12, %p506_p10 }
  0x1e   : > { %p509_p13 = pnand %p508_p4, %p502_p7 }
  0x20   : > { %512 = shalt.err (!%p509_p13)
}
  0x21   : > { %420 = dma.hbm_to_vmem [thread:$0]  (!%p684_p0), %s140_s30, 128, %s143_s4, %s129_s6  }
  0x22   : > { %p148_p11 = pnand %p398_p1, %p147_p2 }
  0x23   : > { %s699_s18 = sand.u32 (!%p148_p11), 1, %s577_s10  }
  0x24   : > { %151 = sbr.rel (%p148_p11) target bundleno = 293 (0x125), region = 28  ;;  %s399_s19 = sshll.u32 (!%p148_p11), %s699_s18, 3 }
  0x25   : > { %s154_s20 = scalar_lea.sflag (!%p148_p11), [#allocation3], %s699_s18  ;;  %s157_s25 = scalar_lea.vmem (!%p148_p11), [#allocation2], %s399_s19 }
  0x29   : > { %564 = dma.done.wait (%p660_p8), %s154_s20, 128  }
  0x2a   : > { %566 = vsyncadd (%p660_p8), %s154_s20, 4294967168  ;;  %v596_v0 = vmov 0.0   ;;  %v180_v1 = vld [vmem:[%s157_s25] sm:$0xff]  ;;  %vm188_vm0 = vcmask 1043456   ;;  %vm184_vm1 = vcmask 31744   ;;  %v276_v12 = vlaneseq  ;;  %s412_s21 = sshll.u32 %s585_s12, 7 }
  0x2b   : > { %257 = vmatprep.mubr.f32.mxu0 %v596_v0  ;;  %v183_v2 = vcombine.high %v180_v1, %v180_v1  ;;  %v181_v3 = vld [vmem:[%s755_s1] sm:$0x1]  ;;  %s177_s28 = scalar_lea.vmem [#allocation5], %s399_s19  ;;  %s305_s4 = scalar_lea.hbm %s756_s2, %s412_s21 }
  0x2c   : > { %v277_v13 = vshrl.u32 %v276_v12, 7  ;;  %s307_s29 = sshll.u32 %s177_s28, 4  ;;  %s291_s5 = scalar_lea.sflag [#allocation4], %s699_s18  ;;  %s308_s29 = int_to_ptr.vmem [resolvable:$true] %s307_s29 }
  0x2d   : > { %401 = vmatprep.subr.msk.mxu0 %vm188_vm0, %v183_v2  ;;  %s513_s6 = scalar_lea.vmem %s308_s29, 128  ;;  %s597_s7 = smov [#allocation5]  }
  0x2e   : > { %402 = vmatpush1.msk.msra.mxu0 %vm188_vm0, %v180_v1  ;;  %v278_v14 = vsub.s32 0, %v277_v13  ;;  %p514_p8 = scmp.ne.s32.totalorder %s308_s29, %s513_s6  ;;  %s517_s8 = sshll.u32 %s597_s7, 4  ;;  %s518_s8 = int_to_ptr.vmem [resolvable:$false] %s517_s8 }
  0x2f   : > { %403 = vmatmul.mubr.msk.f32.vlgmr.msra.gmra.mxu0 %vm184_vm1, %v181_v3  ;;  %s519_s12 = scalar_lea.vmem %s518_s8, 256  ;;  %p520_p0 = scmp.lt.s32.totalorder %s308_s29, %s518_s8 }
  0x30   : > { %p515_p11 = pnand %p514_p8, %p664_p9  ;;  %p521_p1 = scmp.lt.s32.totalorder %s519_s12, %s513_s6 }
  0x32   : > { %p516_p12 = pneg %p515_p11  ;;  %p522_p2 = por %p521_p1, %p520_p0 }
  0x34   : > { %p523_p3 = pnand %p522_p2, %p516_p12 }
  0xef   : > { %v259_v4 = vpop.f32.mrf.mxu0 }
  0xf0   : > { %v404_v5 = vmul.f32 -1.442695, %v259_v4 }
  0xf1   : > { %v261_v6 = vpop.f32.mrf.mxu0 }
  0xf2   : > { %477 = vpow2.f32 %v404_v5  ;;  %v405_v7 = vmul.f32 -1.442695, %v261_v6 }
  0xf4   : > { %479 = vpow2.f32 %v405_v7 }
  0xff   : > { %v478_v8 = vpop.eup %477 }
 0x100   : > { %v270_v9 = vadd.f32 1.0, %v478_v8 }
 0x101   : > { %v480_v10 = vpop.eup %479 }
 0x102   : > { %481 = vrcp.f32 %v270_v9  ;;  %v271_v11 = vadd.f32 1.0, %v480_v10 }
 0x104   : > { %483 = vrcp.f32 %v271_v11 }
 0x10f   : > { %v482_v15 = vpop.eup %481 }
 0x110   : > { %v279_v17 = vrot.slane %v482_v15, %v278_v14 }
 0x111   : > { %v484_v16 = vpop.eup %483 }
 0x112   : > { %v283_v18 = vrot.slane %v484_v16, %v278_v14 }
 0x114   : > { %v286_v19 = vcombine.low %v279_v17, %v283_v18 }
 0x116   : > { %v288_v20 = vmul.f32 %v286_v19, %v180_v1 }
 0x118   : > { %289 = vst [vmem:[%s177_s28] sm:$0xff] %v288_v20 }
 0x119   : > { %526 = shalt.err (!%p523_p3)
}
 0x11a   : > { %s527_s15 = scalar_lea.hbm %s305_s4, 128  ;;  %s531_s19 = scalar_lea.hbm %s756_s2, 256 }
 0x11b   : > { %p528_p5 = scmp.ne.s32.totalorder %s305_s4, %s527_s15  ;;  %p532_p10 = scmp.lt.s32.totalorder %s305_s4, %s756_s2 }
 0x11c   : > { %p533_p4 = scmp.lt.s32.totalorder %s531_s19, %s527_s15 }
 0x11d   : > { %p529_p6 = pnand %p528_p5, %p664_p9 }
 0x11e   : > { %p534_p13 = por %p533_p4, %p532_p10 }
 0x11f   : > { %p530_p7 = pneg %p529_p6 }
 0x121   : > { %p535_p8 = pnand %p534_p13, %p530_p7 }
 0x123   : > { %538 = shalt.err (!%p535_p8)
}
 0x124   : > { %415 = dma.vmem_to_hbm [thread:$0]  (%p664_p9), %s308_s29, 128, %s305_s4, %s291_s5  }
 0x125 PF: > { %s319_s26 = sand.u32 1, %s573_s9   ;;  %p762_p11 = scmp.ne.s32.totalorder %s760_s24, 0 }
 0x126   : > { %p763_p12 = scmp.ge.s32.totalorder %s593_s14, 2  ;;  %s320_s27 = scalar_lea.sflag [#allocation4], %s319_s26 }
 0x128   : > { %p422_p0 = pnand %p763_p12, %p762_p11 }
 0x12a   : > { %p423_p1 = pneg %p422_p0 }
 0x12c   : > { %568 = dma.done.wait (%p423_p1), %s320_s27, 128  }
 0x12d   : > { %570 = vsyncadd (%p423_p1), %s320_s27, 4294967168  ;;  %s18_s14 = sadd.s32 1, %s593_s14   ;;  %s764_s9 = smov %s577_s10 }
 0x12e   : > { %p15_p2 = scmp.ge.s32.totalorder %s18_s14, 4   ;;  %s765_s10 = smov %s581_s11 }
 0x12f   : > { %s766_s11 = smov %s669_s23  ;;  %s767_s12 = smov %s589_s13 }
 0x130   : > { %s768_s13 = smov %s770_s17  ;;  %17 = sbr.rel (!%p15_p2) target bundleno = 6 (0x6), region = 73 }
 0x135   :  { %325 = vsyncpa [#allocation3], 1 }
 0x136   :  { %327 = vsyncpa [#allocation3 + $0x1], 1 }
 0x137   :  { %328 = vsyncpa [#allocation4], 1 }
 0x138   :  { %330 = vsyncpa [#allocation4 + $0x1], 1 }

</bundles_post_ra>
